<compile_context>
chip_gen: v7x
topology: tpu7x:2x2x1
jax: 0.10.0
libtpu: 0.0.40
codegen_flags: <defaults>
</compile_context>

<pallas_src>
import jax
import jax.numpy as jnp
from jax.experimental import pallas as pl
from jax.experimental.pallas import tpu as pltpu

_LANE = 128        # lane quantum
_MAX_COLS = 8192   # widest lane dim we consider for the 2-D slab
_SUB32 = 8         # sublane quantum for 32-bit dtypes


def _add_kernel(a_ref, b_ref, o_ref):
    o_ref[...] = a_ref[...] + b_ref[...]


def _tpu_generation():
    """Return (target_block_bytes_per_input, tensorcores_per_chip)."""
    try:
        kind = jax.devices()[0].device_kind.lower()
    except Exception:
        return 2 * 1024 * 1024, 1
    if "v7" in kind:
        # 2 TCs/chip, 64 MiB VMEM/TC, 3.2 TB/s HBM -> bigger blocks, >=2 steps.
        return 4 * 1024 * 1024, 2
    if "v6" in kind:
        # 32 MiB scoped default, 128 MiB physical -> 4 MiB blocks are free.
        return 4 * 1024 * 1024, 1
    # v5e and older: 16 MiB scoped-VMEM default -> keep 2 MiB blocks.
    return 2 * 1024 * 1024, 1


def _sublane_quantum(dtype):
    """Row-packing quantum: 8 for 4-byte, 16 for 2-byte, 32 for 1-byte dtypes."""
    itemsize = jnp.dtype(dtype).itemsize
    if itemsize >= 4:
        return _SUB32
    return _SUB32 * (4 // max(1, itemsize))


def _choose_slab(total):
    """Pick a lane-dense (rows, cols) 2-D view of the flat data, no padding.

    Prefer the largest multiple-of-128 divisor of `total` up to _MAX_COLS;
    otherwise fall back to the largest divisor <= _MAX_COLS so the output
    lane dim is as close to 128-dense as possible (never a tiny trailing
    dim like 17 or 1)."""
    for c in range(_MAX_COLS, 0, -_LANE):          # 8192, 8064, ..., 128
        if c <= total and total % c == 0:
            return total // c, c
    for c in range(min(total, _MAX_COLS), 0, -1):  # largest divisor fallback
        if total % c == 0:
            return total // c, c
    return total, 1  # unreachable (c == 1 always divides)


def _pallas_add(a: jax.Array, b: jax.Array) -> jax.Array:
    """Elementwise add of two identically-shaped arrays via a Pallas kernel."""
    assert a.shape == b.shape, "Add2 expects identically shaped operands"
    assert a.dtype == b.dtype, "Add2 expects identical dtypes"

    # Degenerate cases: nothing worth launching a kernel for.
    if a.ndim == 0 or a.size == 0:
        return a + b

    orig_shape = a.shape
    total = a.size
    rows, cols = _choose_slab(total)

    a2 = a.reshape(rows, cols)
    b2 = b.reshape(rows, cols)

    itemsize = jnp.dtype(a.dtype).itemsize
    sub = _sublane_quantum(a.dtype)
    target_bytes, n_cores = _tpu_generation()

    # Row tile sized so each input block is ~target_bytes.
    tile_r = target_bytes // max(1, cols * itemsize)
    tile_r = max(sub, min(rows, tile_r))

    # On a 2-TensorCore chip (v7x), make sure non-tiny inputs get >= 2 grid
    # steps so both cores issue DMAs against the shared HBM.
    if (n_cores >= 2 and tile_r >= rows and rows >= 2 * sub
            and total * itemsize >= (1 << 20)):
        tile_r = ((rows + 1) // 2 // sub) * sub

    if tile_r < rows:
        # Partial-extent row block: multiple of the dtype's packing quantum.
        tile_r = max(sub, (tile_r // sub) * sub)
    else:
        # Full-extent block (tiny-input fast path): any row count is legal.
        tile_r = rows

    grid = (pl.cdiv(rows, tile_r),)  # masked partial last block if ragged

    # Explicit VMEM budget from the actual footprint (3 operands x 2 pipeline
    # buffers) plus slack, so tile choice is portable across scoped defaults.
    block_bytes = tile_r * cols * itemsize
    vmem_limit = 3 * 2 * block_bytes + (4 << 20)
    vmem_limit = int(min(max(vmem_limit, 16 << 20), 64 << 20))

    out2 = pl.pallas_call(
        _add_kernel,
        out_shape=jax.ShapeDtypeStruct((rows, cols), a.dtype),
        grid_spec=pl.GridSpec(
            grid=grid,
            in_specs=[
                pl.BlockSpec((tile_r, cols), lambda i: (i, 0)),
                pl.BlockSpec((tile_r, cols), lambda i: (i, 0)),
            ],
            out_specs=pl.BlockSpec((tile_r, cols), lambda i: (i, 0)),
        ),
        compiler_params=pltpu.CompilerParams(
            dimension_semantics=("parallel",),
            vmem_limit_bytes=vmem_limit),
    )(a2, b2)

    return out2.reshape(orig_shape)


class Add2:
    """JAX/Pallas equivalent of the PyTorch Add2 module (no parameters)."""

    def __init__(self, c1, index):
        # `c1` is unused in the reference module as well.
        self.index = index

    def __call__(self, x):
        a, bs = x[0], x[1]
        if self.index == 0:
            return _pallas_add(a, bs[0])
        elif self.index == 1:
            return _pallas_add(a, bs[1])
        # Reference module implicitly returns None for other indices.
        return None


if __name__ == "__main__":
    key = jax.random.PRNGKey(0)
    k0, k1, k2 = jax.random.split(key, 3)

    # NCHW inputs, small shapes (consistent with the module's feature-map use).
    B, C, H, W = 2, 4, 16, 16
    a = jax.random.normal(k0, (B, C, H, W), dtype=jnp.float32)
    b0 = jax.random.normal(k1, (B, C, H, W), dtype=jnp.float32)
    b1 = jax.random.normal(k2, (B, C, H, W), dtype=jnp.float32)

    ok = True
    for idx in (0, 1):
        mod = Add2(C, idx)
        out = jax.block_until_ready(mod((a, (b0, b1))))
        ref = a + (b0 if idx == 0 else b1)
        ok &= (out.shape == ref.shape) and bool(
            jnp.allclose(out, ref, atol=1e-6, rtol=1e-6))

    # Awkward element count with no multiple-of-128 divisor: exercises the
    # lane-dense fallback slab (cols = 3315, single full-extent block).
    ar = jax.random.normal(k0, (3, 5, 13, 17), dtype=jnp.float32)
    br = jax.random.normal(k1, (3, 5, 13, 17), dtype=jnp.float32)
    outr = jax.block_until_ready(_pallas_add(ar, br))
    ok &= bool(jnp.allclose(outr, ar + br, atol=1e-6, rtol=1e-6))

    # Larger f32 input whose row count is not a multiple of the computed row
    # tile on any generation: exercises the masked partial last block.
    al = jax.random.normal(k0, (300, 64, 128), dtype=jnp.float32)
    bl = jax.random.normal(k1, (300, 64, 128), dtype=jnp.float32)
    outl = jax.block_until_ready(_pallas_add(al, bl))
    ok &= bool(jnp.allclose(outl, al + bl, atol=1e-6, rtol=1e-6))

    # bf16: exercises the 16-row sublane packing quantum on the tiled path.
    ah = jax.random.normal(k0, (300, 64, 128), dtype=jnp.bfloat16)
    bh = jax.random.normal(k1, (300, 64, 128), dtype=jnp.bfloat16)
    outh = jax.block_until_ready(_pallas_add(ah, bh))
    refh = ah + bh
    ok &= bool(jnp.allclose(outh.astype(jnp.float32), refh.astype(jnp.float32),
                            atol=1e-2, rtol=1e-2))

    if ok:
        print("KERNEL_OK")
</pallas_src>

<mosaic_0001>
module attributes {stable_mosaic.version = 11 : i64} {
  func.func @_add_kernel(%arg0: i32, %arg1: memref<1x2048xf32, #tpu.memory_space<vmem>>, %arg2: memref<1x2048xf32, #tpu.memory_space<vmem>>, %arg3: memref<1x2048xf32, #tpu.memory_space<vmem>>) attributes {dimension_semantics = [#tpu.dimension_semantics<parallel>], iteration_bounds = array<i64: 1>, scalar_prefetch = 0 : i64, scratch_operands = 0 : i64, tpu.core_type = #tpu.core_type<tc>, window_params = [{transform_indices = @transform_0, window_bounds = array<i64: 1, 2048>}, {transform_indices = @transform_1, window_bounds = array<i64: 1, 2048>}, {transform_indices = @transform_2, window_bounds = array<i64: 1, 2048>}]} {
    %c0 = arith.constant 0 : index
    %c0_0 = arith.constant 0 : index
    %0 = vector.load %arg1[%c0, %c0_0] : memref<1x2048xf32, #tpu.memory_space<vmem>>, vector<1x2048xf32>
    %c0_1 = arith.constant 0 : index
    %c0_2 = arith.constant 0 : index
    %1 = vector.load %arg2[%c0_1, %c0_2] : memref<1x2048xf32, #tpu.memory_space<vmem>>, vector<1x2048xf32>
    %2 = arith.addf %0, %1 : vector<1x2048xf32>
    %c0_3 = arith.constant 0 : index
    %c0_4 = arith.constant 0 : index
    %3 = vector.load %arg3[%c0_3, %c0_4] : memref<1x2048xf32, #tpu.memory_space<vmem>>, vector<1x2048xf32>
    tpu.vector_store %arg3[%c0_3, %c0_4], %2 {strides = array<i32>} : memref<1x2048xf32, #tpu.memory_space<vmem>>, vector<1x2048xf32>,
    return
  }
  func.func @transform_0(%arg0: i32) -> (i32, i32) {
    %c0_i32 = arith.constant 0 : i32
    %c0_i32_0 = arith.constant 0 : i32
    return %arg0, %c0_i32 : i32, i32
  }
  func.func @transform_1(%arg0: i32) -> (i32, i32) {
    %c0_i32 = arith.constant 0 : i32
    %c0_i32_0 = arith.constant 0 : i32
    return %arg0, %c0_i32 : i32, i32
  }
  func.func @transform_2(%arg0: i32) -> (i32, i32) {
    %c0_i32 = arith.constant 0 : i32
    %c0_i32_0 = arith.constant 0 : i32
    return %arg0, %c0_i32 : i32, i32
  }
}

</mosaic_0001>

<bundles_post_ra>
// kernel: tpu_custom_call.1
= control target key start
LH: loop header
LB: loop body
LE: loop exit
PB: predicated region body
PF: predicated region fallthrough
CT: control target
= control target key end

     0   :  { %7 = vsyncpa [#allocation3], 0  ;;  %s189_s0 = inlined_call_operand.hbm [shape: f32[1,2048], index: 0, kind: input, shape index: {}]   ;;  %s190_s1 = inlined_call_operand.hbm [shape: f32[1,2048], index: 1, kind: input, shape index: {}]   ;;  %s191_s2 = inlined_call_operand.hbm [shape: f32[1,2048], index: 2, kind: output, shape index: {}]  }
   0x1   :  { %8 = vsyncpa [#allocation6], 0 }
   0x2   :  { %9 = vsyncpa [#allocation4], 0  ;;  %s135_s9 = smov [#allocation2]   ;;  %s136_s11 = smov [#allocation5]  }
   0x3   :  { %s16_s10 = sshll.u32 %s135_s9, 4  ;;  %s26_s12 = sshll.u32 %s136_s11, 4  ;;  %s17_s10 = int_to_ptr.vmem [resolvable:$true] %s16_s10  ;;  %s27_s12 = int_to_ptr.vmem [resolvable:$true] %s26_s12 }
   0x4   :  { %s63_s15 = scalar_lea.hbm %s189_s0, 256 }
   0x5   :  { %p64_p0 = scmp.ne.s32.totalorder %s189_s0, %s63_s15  ;;  %p67_p1 = scmp.lt.u32.totalorder %s63_s15, %s189_s0 }
   0x7   :  { %p69_p2 = pnand %p67_p1, %p64_p0 }
   0x9   :  { %72 = shalt.err (!%p69_p2)
}
   0xa   :  { %s73_s20 = scalar_lea.vmem %s17_s10, 256  ;;  %p78_p4 = scmp.lt.s32.totalorder %s17_s10, %s17_s10 }
   0xb   :  { %p74_p3 = scmp.ne.s32.totalorder %s17_s10, %s73_s20  ;;  %p79_p5 = scmp.lt.s32.totalorder %s73_s20, %s73_s20 }
   0xd   :  { %p80_p6 = por %p79_p5, %p78_p4 }
   0xf   :  { %p81_p7 = pnand %p80_p6, %p74_p3 }
  0x11   :  { %84 = shalt.err (!%p81_p7)
}
  0x12   :  { %19 = dma.hbm_to_vmem [thread:$0]  %s189_s0, 256, %s17_s10, [#allocation3]  }
  0x13   :  { %s85_s25 = scalar_lea.hbm %s190_s1, 256 }
  0x14   :  { %p86_p8 = scmp.ne.s32.totalorder %s190_s1, %s85_s25  ;;  %p89_p9 = scmp.lt.u32.totalorder %s85_s25, %s190_s1 }
  0x16   :  { %p91_p10 = pnand %p89_p9, %p86_p8 }
  0x18   :  { %94 = shalt.err (!%p91_p10)
}
  0x19   :  { %s95_s30 = scalar_lea.vmem %s27_s12, 256  ;;  %p100_p12 = scmp.lt.s32.totalorder %s27_s12, %s27_s12 }
  0x1a   :  { %p96_p11 = scmp.ne.s32.totalorder %s27_s12, %s95_s30  ;;  %p101_p13 = scmp.lt.s32.totalorder %s95_s30, %s95_s30 }
  0x1c   :  { %p102_p0 = por %p101_p13, %p100_p12 }
  0x1e   :  { %p103_p1 = pnand %p102_p0, %p96_p11 }
  0x20   :  { %106 = shalt.err (!%p103_p1)
}
  0x21   :  { %29 = dma.hbm_to_vmem [thread:$0]  %s190_s1, 256, %s27_s12, [#allocation6]  }
  0x22   :  { %129 = dma.done.wait [#allocation3], 256  }
  0x23   :  { %130 = vsyncadd [#allocation3], 4294967040 }
  0x24   :  { %131 = dma.done.wait [#allocation6], 256  }
  0x25   :  { %132 = vsyncadd [#allocation6], 4294967040  ;;  %s137_s4 = smov [#allocation7]   ;;  %v36_v0 = vld [vmem:[#allocation2] sm:$0xff]  ;;  %v38_v1 = vld [vmem:[#allocation5] sm:$0xff] }
  0x26   :  { %s50_s5 = sshll.u32 %s137_s4, 4  ;;  %v37_v2 = vld [vmem:[#allocation2 + $0x8] sm:$0xff]  ;;  %v40_v3 = vadd.f32 %v38_v1, %v36_v0  ;;  %v39_v4 = vld [vmem:[#allocation5 + $0x8] sm:$0xff]  ;;  %s51_s5 = int_to_ptr.vmem [resolvable:$true] %s50_s5 }
  0x27   :  { %v41_v5 = vadd.f32 %v39_v4, %v37_v2  ;;  %s107_s6 = scalar_lea.vmem %s51_s5, 256  ;;  %p112_p3 = scmp.lt.s32.totalorder %s51_s5, %s51_s5 }
  0x28   :  { %42 = vst [vmem:[#allocation7] sm:$0xff] %v40_v3  ;;  %p108_p2 = scmp.ne.s32.totalorder %s51_s5, %s107_s6  ;;  %p113_p4 = scmp.lt.s32.totalorder %s107_s6, %s107_s6 }
  0x29   :  { %43 = vst [vmem:[#allocation7 + $0x8] sm:$0xff] %v41_v5 }
  0x2a   :  { %p114_p5 = por %p113_p4, %p112_p3 }
  0x2c   :  { %p115_p6 = pnand %p114_p5, %p108_p2 }
  0x2e   :  { %118 = shalt.err (!%p115_p6)
}
  0x2f   :  { %s119_s8 = scalar_lea.hbm %s191_s2, 256 }
  0x30   :  { %p120_p7 = scmp.ne.s32.totalorder %s191_s2, %s119_s8  ;;  %p123_p8 = scmp.lt.u32.totalorder %s119_s8, %s191_s2 }
  0x32   :  { %p125_p9 = pnand %p123_p8, %p120_p7 }
  0x34   :  { %128 = shalt.err (!%p125_p9)
}
  0x35   :  { %53 = dma.vmem_to_hbm [thread:$0]  %s51_s5, 256, %s191_s2, [#allocation4]  }
  0x36   :  { %133 = dma.done.wait [#allocation4], 256  }
  0x37   :  { %134 = vsyncadd [#allocation4], 4294967040 }
  0x38   :  { %57 = vsyncpa [#allocation3], 1 }
  0x39   :  { %58 = vsyncpa [#allocation6], 1 }
  0x3a   :  { %59 = vsyncpa [#allocation4], 1 }

</bundles_post_ra>
